<compile_context>
chip_gen: v5e
topology: v5e:2x2
jax: 0.10.0
libtpu: 0.0.40
codegen_flags: <defaults>
</compile_context>

<pallas_src>
import jax
import jax.numpy as jnp
from jax.experimental import pallas as pl
from jax.experimental.pallas import tpu as pltpu


def _round_up(n, m):
    return ((n + m - 1) // m) * m


def _cdiv(a, b):
    return (a + b - 1) // b


def _fused_model_kernel(x_ref, w0_ref, wstk_ref, bmat_ref, o_ref):
    """Forward pass for one (3, TB) batch tile in (feature, batch) layout.

    x_ref:    (3, TB)     f32  input tile (batch on lanes)
    w0_ref:   (32, 3)     f32  Linear(3,32) weight (torch (out, in) layout)
    wstk_ref: (4, 32, 32) bf16 stacked (out, in) weights: lin1 + 3 folded convs
    bmat_ref: (32, 7)     f32  columns: lin0_b, lin1_b, conv0_b, conv1_b,
                               conv2_b, lin2_w (as 32-vec), lin2_b (broadcast)
    o_ref:    (1, TB)     f32  sigmoid output row (lane-dense)
    """
    x = x_ref[...]                                                # (3, TB)
    w0 = w0_ref[...]                                              # (32, 3)

    # Linear(3, 32) + ReLU: K=3 -> three broadcast multiply-adds on the VPU.
    h = w0[:, 0:1] * x[0:1, :]
    h = h + w0[:, 1:2] * x[1:2, :]
    h = h + w0[:, 2:3] * x[2:3, :]
    h = jnp.maximum(h + bmat_ref[:, 0:1], 0.0)                    # (32, TB) f32

    # Linear(32,32)+ReLU, then 3x [view(-1,16,2) + Conv1d(16,32,2) + ReLU],
    # all folded to 32x32 matmuls (Dropout p=0.0 is identity).
    # bf16 MXU operands, f32 accumulation, f32 bias+ReLU.
    for k in range(4):                                            # static unroll
        hk = jnp.dot(wstk_ref[k], h.astype(jnp.bfloat16),
                     preferred_element_type=jnp.float32)
        h = jnp.maximum(hk + bmat_ref[:, k + 1:k + 2], 0.0)       # (32, TB)

    # Linear(32, 1) + Sigmoid: VPU multiply + sublane (XLU) reduction.
    w2 = bmat_ref[:, 5:6]                                         # (32, 1)
    b2 = bmat_ref[0:1, 6:7]                                       # (1, 1)
    y = jnp.sum(h * w2, axis=0, keepdims=True) + b2               # (1, TB)
    o_ref[...] = jax.nn.sigmoid(y)


def actual_custom_model_forward(x, params, *, tb_max=16384):
    """Pallas wrapper. x: (B, 3) float32 -> (B, 1) float32."""
    B = x.shape[0]

    # Grid sizing:
    #  * at least 2 steps (and an even count) so both v7x TensorCores get work
    #    via the "parallel" batch axis (neutral on single-TC v5e/v6e),
    #  * tile derived from cdiv(B, n_steps) so padding is bounded (~<=255 rows),
    #  * tile is a multiple of 128 (lane-dense blocks).
    n_steps = _cdiv(B, tb_max)
    n_steps = max(2, n_steps + (n_steps % 2))
    tb = _round_up(_cdiv(B, n_steps), 128)
    B_pad = tb * n_steps

    # Transpose to (feature, batch) and zero-pad the batch (lane) axis.
    xt = x.astype(jnp.float32).T                                  # (3, B)
    if B_pad != B:
        xt = jnp.pad(xt, ((0, 0), (0, B_pad - B)))

    # --- pack parameters into a few contiguous, VMEM-resident refs ----------
    w0 = params["lin0_w"].astype(jnp.float32)                     # (32, 3)
    wstk = jnp.stack([                                            # (4, 32, 32)
        params["lin1_w"],
        params["conv0_w"].reshape(32, 32),
        params["conv1_w"].reshape(32, 32),
        params["conv2_w"].reshape(32, 32),
    ]).astype(jnp.bfloat16)
    bmat = jnp.stack([                                            # (32, 7)
        params["lin0_b"], params["lin1_b"],
        params["conv0_b"], params["conv1_b"], params["conv2_b"],
        params["lin2_w"].reshape(32),
        jnp.broadcast_to(params["lin2_b"], (32,)),
    ], axis=1).astype(jnp.float32)

    grid = (B_pad // tb,)
    out = pl.pallas_call(
        _fused_model_kernel,
        out_shape=jax.ShapeDtypeStruct((1, B_pad), jnp.float32),
        grid=grid,
        in_specs=[
            pl.BlockSpec((3, tb), lambda i: (0, i)),              # streamed input
            pl.BlockSpec((32, 3), lambda i: (0, 0)),              # resident weights
            pl.BlockSpec((4, 32, 32), lambda i: (0, 0, 0)),
            pl.BlockSpec((32, 7), lambda i: (0, 0)),
        ],
        out_specs=pl.BlockSpec((1, tb), lambda i: (0, i)),        # lane-dense out
        compiler_params=pltpu.CompilerParams(
            dimension_semantics=("parallel",)),
    )(xt, w0, wstk, bmat)

    return out[0, :B].reshape(B, 1)


def init_params(key):
    """Deterministic PyTorch-like uniform(-1/sqrt(fan_in), 1/sqrt(fan_in)) init."""
    keys = jax.random.split(key, 12)

    def u(k, shape, fan_in):
        bound = 1.0 / jnp.sqrt(float(fan_in))
        return jax.random.uniform(k, shape, jnp.float32, -bound, bound)

    return {
        "lin0_w": u(keys[0], (32, 3), 3),    "lin0_b": u(keys[1], (32,), 3),
        "lin1_w": u(keys[2], (32, 32), 32),  "lin1_b": u(keys[3], (32,), 32),
        "conv0_w": u(keys[4], (32, 16, 2), 32),  "conv0_b": u(keys[5], (32,), 32),
        "conv1_w": u(keys[6], (32, 16, 2), 32),  "conv1_b": u(keys[7], (32,), 32),
        "conv2_w": u(keys[8], (32, 16, 2), 32),  "conv2_b": u(keys[9], (32,), 32),
        "lin2_w": u(keys[10], (1, 32), 32),  "lin2_b": u(keys[11], (1,), 32),
    }


def reference_forward(x, params):
    """Pure-JAX f32 reference replicating PyTorch semantics (real Conv1d ops)."""
    h = jax.nn.relu(x @ params["lin0_w"].T + params["lin0_b"])
    h = jax.nn.relu(h @ params["lin1_w"].T + params["lin1_b"])
    for i in range(3):
        h = h.reshape(-1, 16, 2)                       # NCW
        h = jax.lax.conv_general_dilated(
            h, params[f"conv{i}_w"], window_strides=(1,), padding="VALID",
            dimension_numbers=("NCH", "OIH", "NCH"))   # -> (B, 32, 1)
        h = jax.nn.relu(h + params[f"conv{i}_b"][None, :, None])
    h = h.reshape(h.shape[0], -1)                      # (B, 32)
    return jax.nn.sigmoid(h @ params["lin2_w"].T + params["lin2_b"])


if __name__ == "__main__":
    key = jax.random.PRNGKey(0)
    k_param, k_x1, k_x2 = jax.random.split(key, 3)

    params = init_params(k_param)

    # Small batch: pads up to 2 x 128-wide tiles (minimum 2 grid steps).
    x = jax.random.normal(k_x1, (8, 3), dtype=jnp.float32)
    out = jax.block_until_ready(actual_custom_model_forward(x, params))
    ref = jax.block_until_ready(reference_forward(x, params))
    assert out.shape == (8, 1)
    # bf16 MXU operands (f32 accumulation) -> tolerance loosened vs. f32 ref.
    assert jnp.allclose(out, ref, atol=1e-2, rtol=1e-2), "mismatch vs. reference (B=8)"

    # Non-multiple batch with a small tile cap to exercise the multi-step
    # grid + lane-padding path (4 steps of 256 columns).
    x2 = jax.random.normal(k_x2, (1000, 3), dtype=jnp.float32)
    out2 = jax.block_until_ready(
        actual_custom_model_forward(x2, params, tb_max=256))
    ref2 = jax.block_until_ready(reference_forward(x2, params))
    assert out2.shape == (1000, 1)
    assert jnp.allclose(out2, ref2, atol=1e-2, rtol=1e-2), "mismatch vs. reference (B=1000)"

    print("KERNEL_OK")
</pallas_src>

<mosaic_0001>
module attributes {stable_mosaic.version = 11 : i64} {
  func.func @_fused_model_kernel(%arg0: i32, %arg1: memref<3x128xf32, #tpu.memory_space<vmem>>, %arg2: memref<32x3xf32, #tpu.memory_space<vmem>>, %arg3: memref<4x32x32xbf16, #tpu.memory_space<vmem>>, %arg4: memref<32x7xf32, #tpu.memory_space<vmem>>, %arg5: memref<1x128xf32, #tpu.memory_space<vmem>>) attributes {dimension_semantics = [#tpu.dimension_semantics<parallel>], iteration_bounds = array<i64: 2>, scalar_prefetch = 0 : i64, scratch_operands = 0 : i64, tpu.core_type = #tpu.core_type<tc>, window_params = [{transform_indices = @transform_0, window_bounds = array<i64: 3, 128>}, {pipeline_mode = #tpu.pipeline_mode<synchronous>, transform_indices = @transform_1, window_bounds = array<i64: 32, 3>}, {pipeline_mode = #tpu.pipeline_mode<synchronous>, transform_indices = @transform_2, window_bounds = array<i64: 4, 32, 32>}, {pipeline_mode = #tpu.pipeline_mode<synchronous>, transform_indices = @transform_3, window_bounds = array<i64: 32, 7>}, {transform_indices = @transform_4, window_bounds = array<i64: 1, 128>}]} {
    %c0 = arith.constant 0 : index
    %c0_0 = arith.constant 0 : index
    %0 = vector.load %arg1[%c0, %c0_0] : memref<3x128xf32, #tpu.memory_space<vmem>>, vector<3x128xf32>
    %c0_1 = arith.constant 0 : index
    %c0_2 = arith.constant 0 : index
    %1 = vector.load %arg2[%c0_1, %c0_2] : memref<32x3xf32, #tpu.memory_space<vmem>>, vector<32x3xf32>
    %2 = vector.extract_strided_slice %1 {offsets = [0, 0], sizes = [32, 1], strides = [1, 1]} : vector<32x3xf32> to vector<32x1xf32>
    %3 = vector.extract_strided_slice %0 {offsets = [0, 0], sizes = [1, 128], strides = [1, 1]} : vector<3x128xf32> to vector<1x128xf32>
    %4 = vector.broadcast %2 : vector<32x1xf32> to vector<32x128xf32>
    %5 = vector.broadcast %3 : vector<1x128xf32> to vector<32x128xf32>
    %6 = arith.mulf %4, %5 : vector<32x128xf32>
    %7 = vector.extract_strided_slice %1 {offsets = [0, 1], sizes = [32, 1], strides = [1, 1]} : vector<32x3xf32> to vector<32x1xf32>
    %8 = vector.extract_strided_slice %0 {offsets = [1, 0], sizes = [1, 128], strides = [1, 1]} : vector<3x128xf32> to vector<1x128xf32>
    %9 = vector.broadcast %7 : vector<32x1xf32> to vector<32x128xf32>
    %10 = vector.broadcast %8 : vector<1x128xf32> to vector<32x128xf32>
    %11 = arith.mulf %9, %10 : vector<32x128xf32>
    %12 = arith.addf %6, %11 : vector<32x128xf32>
    %13 = vector.extract_strided_slice %1 {offsets = [0, 2], sizes = [32, 1], strides = [1, 1]} : vector<32x3xf32> to vector<32x1xf32>
    %14 = vector.extract_strided_slice %0 {offsets = [2, 0], sizes = [1, 128], strides = [1, 1]} : vector<3x128xf32> to vector<1x128xf32>
    %15 = vector.broadcast %13 : vector<32x1xf32> to vector<32x128xf32>
    %16 = vector.broadcast %14 : vector<1x128xf32> to vector<32x128xf32>
    %17 = arith.mulf %15, %16 : vector<32x128xf32>
    %18 = arith.addf %12, %17 : vector<32x128xf32>
    %c0_3 = arith.constant 0 : index
    %c0_4 = arith.constant 0 : index
    %19 = vector.load %arg4[%c0_3, %c0_4] : memref<32x7xf32, #tpu.memory_space<vmem>>, vector<32x1xf32>
    %20 = vector.broadcast %19 : vector<32x1xf32> to vector<32x128xf32>
    %21 = arith.addf %18, %20 : vector<32x128xf32>
    %cst = arith.constant 0.000000e+00 : f32
    %22 = vector.broadcast %cst : f32 to vector<32x128xf32>
    %23 = arith.maximumf %21, %22 : vector<32x128xf32>
    %c0_5 = arith.constant 0 : index
    %c0_6 = arith.constant 0 : index
    %c0_7 = arith.constant 0 : index
    %24 = vector.load %arg3[%c0_5, %c0_6, %c0_7] : memref<4x32x32xbf16, #tpu.memory_space<vmem>>, vector<1x32x32xbf16>
    %25 = vector.shape_cast %24 : vector<1x32x32xbf16> to vector<32x32xbf16>
    %26 = arith.truncf %23 : vector<32x128xf32> to vector<32x128xbf16>
    %cst_8 = arith.constant dense<0.000000e+00> : vector<32x128xf32>
    %27 = tpu.matmul %25, %26, %cst_8 {dimension_numbers = #tpu.dot_dimension_numbers<[1], [0], [0], [1], [0, 0, 1, 1], [], []>} : vector<32x32xbf16>, vector<32x128xbf16>, vector<32x128xf32> -> vector<32x128xf32>
    %c0_9 = arith.constant 0 : index
    %c1 = arith.constant 1 : index
    %28 = vector.load %arg4[%c0_9, %c1] : memref<32x7xf32, #tpu.memory_space<vmem>>, vector<32x1xf32>
    %29 = vector.broadcast %28 : vector<32x1xf32> to vector<32x128xf32>
    %30 = arith.addf %27, %29 : vector<32x128xf32>
    %cst_10 = arith.constant 0.000000e+00 : f32
    %31 = vector.broadcast %cst_10 : f32 to vector<32x128xf32>
    %32 = arith.maximumf %30, %31 : vector<32x128xf32>
    %c1_11 = arith.constant 1 : index
    %c0_12 = arith.constant 0 : index
    %c0_13 = arith.constant 0 : index
    %33 = vector.load %arg3[%c1_11, %c0_12, %c0_13] : memref<4x32x32xbf16, #tpu.memory_space<vmem>>, vector<1x32x32xbf16>
    %34 = vector.shape_cast %33 : vector<1x32x32xbf16> to vector<32x32xbf16>
    %35 = arith.truncf %32 : vector<32x128xf32> to vector<32x128xbf16>
    %cst_14 = arith.constant dense<0.000000e+00> : vector<32x128xf32>
    %36 = tpu.matmul %34, %35, %cst_14 {dimension_numbers = #tpu.dot_dimension_numbers<[1], [0], [0], [1], [0, 0, 1, 1], [], []>} : vector<32x32xbf16>, vector<32x128xbf16>, vector<32x128xf32> -> vector<32x128xf32>
    %c0_15 = arith.constant 0 : index
    %c2 = arith.constant 2 : index
    %37 = vector.load %arg4[%c0_15, %c2] : memref<32x7xf32, #tpu.memory_space<vmem>>, vector<32x1xf32>
    %38 = vector.broadcast %37 : vector<32x1xf32> to vector<32x128xf32>
    %39 = arith.addf %36, %38 : vector<32x128xf32>
    %cst_16 = arith.constant 0.000000e+00 : f32
    %40 = vector.broadcast %cst_16 : f32 to vector<32x128xf32>
    %41 = arith.maximumf %39, %40 : vector<32x128xf32>
    %c2_17 = arith.constant 2 : index
    %c0_18 = arith.constant 0 : index
    %c0_19 = arith.constant 0 : index
    %42 = vector.load %arg3[%c2_17, %c0_18, %c0_19] : memref<4x32x32xbf16, #tpu.memory_space<vmem>>, vector<1x32x32xbf16>
    %43 = vector.shape_cast %42 : vector<1x32x32xbf16> to vector<32x32xbf16>
    %44 = arith.truncf %41 : vector<32x128xf32> to vector<32x128xbf16>
    %cst_20 = arith.constant dense<0.000000e+00> : vector<32x128xf32>
    %45 = tpu.matmul %43, %44, %cst_20 {dimension_numbers = #tpu.dot_dimension_numbers<[1], [0], [0], [1], [0, 0, 1, 1], [], []>} : vector<32x32xbf16>, vector<32x128xbf16>, vector<32x128xf32> -> vector<32x128xf32>
    %c0_21 = arith.constant 0 : index
    %c3 = arith.constant 3 : index
    %46 = vector.load %arg4[%c0_21, %c3] : memref<32x7xf32, #tpu.memory_space<vmem>>, vector<32x1xf32>
    %47 = vector.broadcast %46 : vector<32x1xf32> to vector<32x128xf32>
    %48 = arith.addf %45, %47 : vector<32x128xf32>
    %cst_22 = arith.constant 0.000000e+00 : f32
    %49 = vector.broadcast %cst_22 : f32 to vector<32x128xf32>
    %50 = arith.maximumf %48, %49 : vector<32x128xf32>
    %c3_23 = arith.constant 3 : index
    %c0_24 = arith.constant 0 : index
    %c0_25 = arith.constant 0 : index
    %51 = vector.load %arg3[%c3_23, %c0_24, %c0_25] : memref<4x32x32xbf16, #tpu.memory_space<vmem>>, vector<1x32x32xbf16>
    %52 = vector.shape_cast %51 : vector<1x32x32xbf16> to vector<32x32xbf16>
    %53 = arith.truncf %50 : vector<32x128xf32> to vector<32x128xbf16>
    %cst_26 = arith.constant dense<0.000000e+00> : vector<32x128xf32>
    %54 = tpu.matmul %52, %53, %cst_26 {dimension_numbers = #tpu.dot_dimension_numbers<[1], [0], [0], [1], [0, 0, 1, 1], [], []>} : vector<32x32xbf16>, vector<32x128xbf16>, vector<32x128xf32> -> vector<32x128xf32>
    %c0_27 = arith.constant 0 : index
    %c4 = arith.constant 4 : index
    %55 = vector.load %arg4[%c0_27, %c4] : memref<32x7xf32, #tpu.memory_space<vmem>>, vector<32x1xf32>
    %56 = vector.broadcast %55 : vector<32x1xf32> to vector<32x128xf32>
    %57 = arith.addf %54, %56 : vector<32x128xf32>
    %cst_28 = arith.constant 0.000000e+00 : f32
    %58 = vector.broadcast %cst_28 : f32 to vector<32x128xf32>
    %59 = arith.maximumf %57, %58 : vector<32x128xf32>
    %c0_29 = arith.constant 0 : index
    %c5 = arith.constant 5 : index
    %60 = vector.load %arg4[%c0_29, %c5] : memref<32x7xf32, #tpu.memory_space<vmem>>, vector<32x1xf32>
    %c0_30 = arith.constant 0 : index
    %c6 = arith.constant 6 : index
    %61 = vector.load %arg4[%c0_30, %c6] : memref<32x7xf32, #tpu.memory_space<vmem>>, vector<1x1xf32>
    %62 = vector.broadcast %60 : vector<32x1xf32> to vector<32x128xf32>
    %63 = arith.mulf %59, %62 : vector<32x128xf32>
    %cst_31 = arith.constant dense<0.000000e+00> : vector<128xf32>
    %64 = vector.multi_reduction <add>, %63, %cst_31 [0] : vector<32x128xf32> to vector<128xf32>
    %65 = vector.shape_cast %64 : vector<128xf32> to vector<1x128xf32>
    %66 = vector.broadcast %61 : vector<1x1xf32> to vector<1x128xf32>
    %67 = arith.addf %65, %66 : vector<1x128xf32>
    %68 = arith.negf %67 : vector<1x128xf32>
    %69 = math.exp %68 : vector<1x128xf32>
    %cst_32 = arith.constant 1.000000e+00 : f32
    %70 = vector.broadcast %cst_32 : f32 to vector<1x128xf32>
    %71 = arith.addf %70, %69 : vector<1x128xf32>
    %72 = arith.divf %70, %71 : vector<1x128xf32>
    %c0_33 = arith.constant 0 : index
    %c0_34 = arith.constant 0 : index
    %73 = vector.load %arg5[%c0_33, %c0_34] : memref<1x128xf32, #tpu.memory_space<vmem>>, vector<1x128xf32>
    tpu.vector_store %arg5[%c0_33, %c0_34], %72 {strides = array<i32>} : memref<1x128xf32, #tpu.memory_space<vmem>>, vector<1x128xf32>,
    return
  }
  func.func @transform_0(%arg0: i32) -> (i32, i32) {
    %c0_i32 = arith.constant 0 : i32
    %c0_i32_0 = arith.constant 0 : i32
    return %c0_i32, %arg0 : i32, i32
  }
  func.func @transform_1(%arg0: i32) -> (i32, i32) {
    %c0_i32 = arith.constant 0 : i32
    %c0_i32_0 = arith.constant 0 : i32
    %c0_i32_1 = arith.constant 0 : i32
    return %c0_i32, %c0_i32_0 : i32, i32
  }
  func.func @transform_2(%arg0: i32) -> (i32, i32, i32) {
    %c0_i32 = arith.constant 0 : i32
    %c0_i32_0 = arith.constant 0 : i32
    %c0_i32_1 = arith.constant 0 : i32
    %c0_i32_2 = arith.constant 0 : i32
    return %c0_i32, %c0_i32_0, %c0_i32_1 : i32, i32, i32
  }
  func.func @transform_3(%arg0: i32) -> (i32, i32) {
    %c0_i32 = arith.constant 0 : i32
    %c0_i32_0 = arith.constant 0 : i32
    %c0_i32_1 = arith.constant 0 : i32
    return %c0_i32, %c0_i32_0 : i32, i32
  }
  func.func @transform_4(%arg0: i32) -> (i32, i32) {
    %c0_i32 = arith.constant 0 : i32
    %c0_i32_0 = arith.constant 0 : i32
    return %c0_i32, %arg0 : i32, i32
  }
}

</mosaic_0001>

<bundles_post_ra>
// kernel: tpu_custom_call.1
= control target key start
LH: loop header
LB: loop body
LE: loop exit
PB: predicated region body
PF: predicated region fallthrough
CT: control target
= control target key end

     0   :  { %9 = vsyncpa [#allocation3], 0  ;;  %s1215_s0 = inlined_call_operand.hbm [shape: f32[3,256], index: 0, kind: input, shape index: {}]   ;;  %s1216_s1 = inlined_call_operand.vmem [shape: f32[32,3], index: 1, kind: input, shape index: {}]   ;;  %s1217_s2 = inlined_call_operand.vmem [shape: bf16[4,32,32], index: 2, kind: input, shape index: {}]   ;;  %s1218_s3 = inlined_call_operand.vmem [shape: f32[32,7], index: 3, kind: input, shape index: {}]   ;;  %s1219_s4 = inlined_call_operand.hbm [shape: f32[1,256], index: 4, kind: output, shape index: {}]  }
   0x1   :  { %11 = vsyncpa [#allocation3 + $0x1], 0 }
   0x2   :  { %12 = vsyncpa [#allocation4], 0 }
   0x3   :  { %14 = vsyncpa [#allocation4 + $0x1], 0  ;;  %s993_s15 = smov 0   ;;  %s995_s16 = smov 0  }
   0x4   :  { %s997_s17 = smov 0   ;;  %s999_s18 = smov 0  }
   0x5 LB: > { %s1014_s19 = sadd.s32 4294967295, %s959_s18   ;;  %s710_s20 = sadd.s32 4294967294, %s959_s18   ;;  %s959_s18 = sphi %s999_s18, %s1229_s18   ;;  %s955_s17 = sphi %s997_s17, %s1228_s17   ;;  %s951_s16 = sphi %s995_s16, %s1227_s16   ;;  %s947_s15 = sphi %s993_s15, %s1226_s15  }
   0x6   : > { %s1018_s21 = sadd.s32 1, %s959_s18   ;;  %s27_s22 = sadd.s32 1, %s955_s17 }
   0x7   : > { %s24_s23 = ssub.s32 %s959_s18, %s1018_s21  ;;  %p34_p0 = scmp.ne.s32.totalorder %s955_s17, %s951_s16 }
   0x8   : > { %p25_p1 = scmp.eq.s32.totalorder %s24_s23, 0  ;;  %p35_p2 = scmp.eq.s32.totalorder %s959_s18, 0 }
   0x9   : > { %p40_p3 = scmp.ne.s32.totalorder %s951_s16, %s947_s15  ;;  %p41_p4 = scmp.eq.s32.totalorder %s1014_s19, 0 }
   0xa   : > { %s1030_s24 = scalar_select %p25_p1, %s955_s17, %s27_s22  }
   0xb   : > { %p1032_p5 = por %p35_p2, %p34_p0  ;;  %p1036_p6 = por %p41_p4, %p40_p3 }
   0xc   : > { %p127_p7 = scmp.eq.s32.totalorder %s1014_s19, 1  ;;  %p133_p8 = scmp.eq.s32.totalorder %s710_s20, 1 }
   0xd   : > { %p792_p10 = scmp.lt.s32.totalorder %s959_s18, 2  ;;  %s162_s29 = sand.u32 1, %s955_s17  }
   0xe   : > { %p1043_p11 = por %p127_p7, %p34_p0  ;;  %p1047_p12 = por %p133_p8, %p40_p3 }
   0xf   : > { %s714_s30 = sshll.u32 %s959_s18, 2  ;;  %s713_s5 = sshll.u32 %s162_s29, 2 }
  0x10   : > { %s170_s8 = scalar_lea.hbm %s1215_s0, %s714_s30  ;;  %s166_s10 = scalar_lea.vmem [#allocation2], %s713_s5 }
  0x11   : > { %s172_s9 = sshll.u32 %s170_s8, 4  ;;  %s174_s11 = sshll.u32 %s166_s10, 4  ;;  %s173_s9 = int_to_ptr.hbm [resolvable:$true] %s172_s9  ;;  %s175_s11 = int_to_ptr.vmem [resolvable:$true] %s174_s11 }
  0x12   : > { %p1058_p13 = pnand %p792_p10, %p1032_p5  ;;  %p715_p0 = scmp.ge.s32.totalorder %s959_s18, 1 }
  0x13   : > { %p179_p1 = scmp.lt.s32.totalorder %s959_s18, 3  ;;  %s163_s13 = scalar_lea.sflag [#allocation3], %s162_s29 }
  0x14   : > { %s863_s14 = sshra.s32 %s173_s9, 4  ;;  %p867_p3 = pneg %p1058_p13  ;;  %s864_s14 = int_to_ptr.hbm [resolvable:$true] %s863_s14 }
  0x15   : > { %s865_s20 = scalar_lea.hbm %s864_s14, 4  ;;  %s870_s25 = scalar_lea.hbm %s1215_s0, 8 }
  0x16   : > { %p866_p2 = scmp.ne.s32.totalorder %s864_s14, %s865_s20  ;;  %p871_p5 = scmp.lt.s32.totalorder %s864_s14, %s1215_s0 }
  0x17   : > { %p872_p8 = scmp.lt.s32.totalorder %s870_s25, %s865_s20 }
  0x18   : > { %p868_p4 = pnand %p867_p3, %p866_p2 }
  0x19   : > { %p873_p10 = por %p872_p8, %p871_p5 }
  0x1a   : > { %p869_p7 = pneg %p868_p4 }
  0x1c   : > { %p874_p9 = pnand %p873_p10, %p869_p7 }
  0x1e   : > { %877 = shalt.err (!%p874_p9)
}
  0x1f   : > { %787 = dma.hbm_to_vmem [thread:$0]  (!%p1058_p13), %s173_s9, 64, %s175_s11, %s163_s13  }
  0x20   : > { %p180_p2 = pnand %p715_p0, %p179_p1 }
  0x21   : > { %s1079_s29 = sand.u32 (!%p180_p2), 1, %s951_s16  }
  0x22   : > { %183 = sbr.rel (%p180_p2) target bundleno = 913 (0x391), region = 36  ;;  %s716_s6 = sshll.u32 (!%p180_p2), %s1079_s29, 2 }
  0x23   : > { %s186_s7 = scalar_lea.sflag (!%p180_p2), [#allocation3], %s1079_s29  ;;  %s1083_s8 = scalar_lea.vmem (!%p180_p2), [#allocation2], %s716_s6 }
  0x27   : > { %938 = dma.done.wait (%p1036_p6), %s186_s7, 64  }
  0x28   : > { %940 = vsyncadd (%p1036_p6), %s186_s7, 4294967232  ;;  %v961_v0 = vmov 1   ;;  %v962_v1 = vmov 2   ;;  %v218_v2 = vld [vmem:[%s1216_s1 + $0x10] sm:$0xff]  ;;  %v217_v3 = vld [vmem:[%s1216_s1 + $0x8] sm:$0xff]  ;;  %v963_v5 = vmov 0   ;;  %s640_s13 = scalar_lea.hbm %s1219_s4, %s1014_s19 }
  0x29   : > { %837 = vset.pattern.permute.xlu0 %v961_v0  ;;  %833 = vset.pattern.permute.xlu1 %v961_v0  ;;  %v219_v4 = vld [vmem:[%s1216_s1 + $0x18] sm:$0xff]  ;;  %v216_v6 = vld [vmem:[%s1216_s1] sm:$0xff]  ;;  %v1109_v8 = vld [vmem:[%s1218_s3 + $0x10] sm:$0xff]  ;;  %vm359_vm0 = vcmask 261120   ;;  %s213_s14 = scalar_lea.vmem [#allocation5], %s1079_s29  ;;  %s644_s20 = sshll.u32 %s640_s13, 4  ;;  %s645_s20 = int_to_ptr.hbm [resolvable:$true] %s644_s20 }
  0x2a   : > { %834 = vset.pattern.permute.xlu2 %v962_v1  ;;  %254 = vperm.xlu1 %833, %v218_v2   ;;  %v1104_v7 = vld [vmem:[%s1218_s3] sm:$0xff]  ;;  %v1115_v9 = vld [vmem:[%s1218_s3 + $0x18] sm:$0xff]  ;;  %v1122_v10 = vld [vmem:[%s1218_s3 + $0x8] sm:$0xff]  ;;  %s642_s26 = sshll.u32 %s213_s14, 4  ;;  %s632_s19 = scalar_lea.sflag [#allocation4], %s1079_s29  ;;  %s643_s26 = int_to_ptr.vmem [resolvable:$true] %s642_s26 }
  0x2b   : > { %250 = vperm.xlu0 %837, %v217_v3   ;;  %279 = vperm.xlu2 %834, %v218_v2   ;;  %v215_v19 = vld [vmem:[%s1083_s8] sm:$0x7]  ;;  %v773_v62 = vld [vmem:[%s1217_s2 + $0x8] sm:$0xff]  ;;  %s907_s22 = sshra.s32 %s645_s20, 4  ;;  %s913_s5 = scalar_lea.hbm %s1219_s4, 2  ;;  %s908_s22 = int_to_ptr.hbm [resolvable:$true] %s907_s22 }
  0x2c   : > { %v240_v21 = vperm.slane %v215_v19, 0  ;;  %v261_v23 = vperm.slane %v215_v19, 1  ;;  %v286_v25 = vperm.slane %v215_v19, 2  ;;  %v772_v61 = vld [vmem:[%s1217_s2] sm:$0xff]  ;;  %s909_s23 = scalar_lea.hbm %s908_s22, 1  ;;  %p914_p0 = scmp.lt.s32.totalorder %s908_s22, %s1219_s4 }
  0x2d   : > { %p910_p6 = scmp.ne.s32.totalorder %s908_s22, %s909_s23  ;;  %p915_p1 = scmp.lt.s32.totalorder %s913_s5, %s909_s23 }
  0x2f   : > { %p911_p9 = pnand %p910_p6, %p1043_p11  ;;  %p916_p3 = por %p915_p1, %p914_p0 }
  0x31   : > { %p912_p13 = pneg %p911_p9 }
  0x32   : > { %258 = vperm.xlu1 %833, %v219_v4  }
  0x33   : > { %838 = vset.pattern.permute.xlu0 %v963_v5  ;;  %283 = vperm.xlu2 %834, %v219_v4   ;;  %p917_p4 = pnand %p916_p3, %p912_p13 }
  0x34   : > { %232 = vperm.xlu0 %838, %v218_v2  }
  0x3a   : > { %835 = vset.pattern.permute.xlu1 %v963_v5 }
  0x3b   : > { %227 = vperm.xlu1 %835, %v217_v3   ;;  %836 = vset.pattern.permute.xlu2 %v961_v0 }
  0x3c   : > { %237 = vperm.xlu0 %838, %v219_v4   ;;  %246 = vperm.xlu2 %836, %v216_v6  }
  0x43   : > { %839 = vset.pattern.permute.xlu1 %v962_v1 }
  0x44   : > { %222 = vperm.xlu0 %838, %v216_v6   ;;  %271 = vperm.xlu1 %839, %v216_v6  }
  0x45   : > { %840 = vset.pattern.permute.xlu2 %v962_v1 }
  0x46   : > { %275 = vperm.xlu2 %840, %v217_v3  }
  0x4c   : > { %301 = vperm.xlu0 %838, %v1104_v7   ;;  %841 = vset.pattern.permute.xlu1 %v963_v5 }
  0x4d   : > { %311 = vperm.xlu1 %841, %v1109_v8  }
  0x4e   : > { %842 = vset.pattern.permute.xlu2 %v963_v5 }
  0x4f   : > { %316 = vperm.xlu2 %842, %v1115_v9  }
  0x54   : > { %845 = vset.pattern.permute.xlu0 %v961_v0 }
  0x55   : > { %338 = vperm.xlu0 %845, %v1122_v10   ;;  %306 = vperm.xlu1 %841, %v1122_v10  }
  0x57   : > { %843 = vset.pattern.permute.xlu2 %v961_v0 }
  0x58   : > { %342 = vperm.xlu2 %843, %v1109_v8  }
  0x5d   : > { %844 = vset.pattern.permute.xlu1 %v961_v0 }
  0x5e   : > { %346 = vperm.xlu1 %844, %v1115_v9  }
  0x60   : > { %334 = vperm.xlu2 %843, %v1104_v7  }
  0x66   : > { %846 = vset.pattern.permute.xlu1 %v962_v1 }
  0x67   : > { %405 = vperm.xlu1 %846, %v1109_v8  }
  0x68   : > { %847 = vset.pattern.permute.xlu2 %v962_v1 }
  0x69   : > { %409 = vperm.xlu2 %847, %v1115_v9  }
  0x6f   : > { %397 = vperm.xlu1 %846, %v1104_v7  }
  0x71   : > { %401 = vperm.xlu2 %847, %v1122_v10  }
  0x85   : > { %v280_v11 = vpop.permute.xlu2 %279 }
  0x86   : > { %v289_v36 = vmul.f32 %v286_v25, %v280_v11 }
  0x8d   : > { %v284_v14 = vpop.permute.xlu2 %283 }
  0x8e   : > { %v290_v30 = vmul.f32 %v286_v25, %v284_v14 }
  0x96   : > { %v247_v17 = vpop.permute.xlu2 %246 }
  0x97   : > { %v262_v38 = vmul.f32 %v261_v23, %v247_v17 }
  0x9c   : > { %v255_v12 = vpop.permute.xlu1 %254 }
  0x9d   : > { %v251_v13 = vpop.permute.xlu0 %250  ;;  %v264_v31 = vmul.f32 %v261_v23, %v255_v12 }
  0x9e   : > { %v263_v43 = vmul.f32 %v261_v23, %v251_v13 }
  0xa0   : > { %v276_v22 = vpop.permute.xlu2 %275 }
  0xa1   : > { %v288_v47 = vmul.f32 %v286_v25, %v276_v22  ;;  %v775_v22 = vld [vmem:[%s1217_s2 + $0x18] sm:$0xff] }
  0xa4   : > { %v259_v15 = vpop.permute.xlu1 %258 }
  0xa5   : > { %v265_v26 = vmul.f32 %v261_v23, %v259_v15 }
  0xa6   : > { %v233_v16 = vpop.permute.xlu0 %232 }
  0xa7   : > { %v243_v27 = vmul.f32 %v240_v21, %v233_v16 }
  0xa9   : > { %v268_v33 = vadd.f32 %v264_v31, %v243_v27  ;;  %v317_v35 = vpop.permute.xlu2 %316 }
  0xab   : > { %v293_v41 = vadd.f32 %v289_v36, %v268_v33 }
  0xad   : > { %v228_v18 = vpop.permute.xlu1 %227 }
  0xae   : > { %v238_v20 = vpop.permute.xlu0 %237  ;;  %v242_v39 = vmul.f32 %v240_v21, %v228_v18 }
  0xaf   : > { %v244_v24 = vmul.f32 %v240_v21, %v238_v20 }
  0xb0   : > { %v267_v48 = vadd.f32 %v263_v43, %v242_v39  ;;  %v777_v43 = vld [vmem:[%s1217_s2 + $0x28] sm:$0xff] }
  0xb1   : > { %v269_v28 = vadd.f32 %v265_v26, %v244_v24  ;;  %v964_v24 = vmov 3  }
  0xb2   : > { %v292_v55 = vadd.f32 %v288_v47, %v267_v48  ;;  %v343_v1 = vpop.permute.xlu2 %342  ;;  %849 = vset.pattern.permute.xlu1 %v964_v24  ;;  %848 = vset.pattern.permute.xlu0 %v964_v24 }
  0xb3   : > { %v294_v34 = vadd.f32 %v290_v30, %v269_v28  ;;  %471 = vperm.xlu1 %849, %v1115_v9   ;;  %467 = vperm.xlu0 %848, %v1109_v8  }
  0xb4   : > { %850 = vset.pattern.permute.xlu2 %v964_v24 }
  0xb5   : > { %v322_v40 = vadd.f32 %v317_v35, %v294_v34  ;;  %459 = vperm.xlu2 %850, %v1104_v7  }
  0xb6   : > { %v272_v29 = vpop.permute.xlu1 %271  ;;  %v223_v32 = vpop.permute.xlu0 %222 }
  0xb7   : > { %v241_v37 = vmul.f32 %v240_v21, %v223_v32  ;;  %v287_v45 = vmul.f32 %v286_v25, %v272_v29  ;;  %v326_v49 = vmax.f32 %v322_v40, 0.0  ;;  %v774_v21 = vld [vmem:[%s1217_s2 + $0x10] sm:$0xff] }
  0xb9   : > { %v266_v44 = vadd.f32 %v262_v38, %v241_v37 }
  0xba   : > { %v335_v6 = vpop.permute.xlu2 %334 }
  0xbb   : > { %v291_v52 = vadd.f32 %v287_v45, %v266_v44  ;;  %463 = vperm.xlu1 %849, %v1122_v10   ;;  %v965_v45 = vmov 4  }
  0xbc   : > { %852 = vset.pattern.permute.xlu0 %v965_v45 }
  0xbd   : > { %525 = vperm.xlu0 %852, %v1122_v10   ;;  %851 = vset.pattern.permute.xlu2 %v965_v45 }
  0xbe   : > { %v302_v51 = vpop.permute.xlu0 %301  ;;  %521 = vperm.xlu2 %851, %v1104_v7  }
  0xbf   : > { %v312_v42 = vpop.permute.xlu1 %311  ;;  %v319_v54 = vadd.f32 %v302_v51, %v291_v52  ;;  %v966_v52 = vmov 5  }
  0xc0   : > { %v321_v46 = vadd.f32 %v312_v42, %v293_v41  ;;  %v776_v42 = vld [vmem:[%s1217_s2 + $0x20] sm:$0xff] }
  0xc1   : > { %v323_v58 = vmax.f32 %v319_v54, 0.0 }
  0xc2   : > { %v325_v50 = vmax.f32 %v321_v46, 0.0 }
  0xc3   : > { %v410_v26 = vpop.permute.xlu2 %409  ;;  %853 = vset.pattern.permute.xlu1 %v965_v45 }
  0xc4   : > { %v332_v53 = vpack.c.bf16 %v326_v49, %v325_v50  ;;  %529 = vperm.xlu1 %853, %v1109_v8  }
  0xc5   : > { %856 = vset.pattern.permute.xlu0 %v966_v52 }
  0xc6   : > { %372 = vmatpush.bf16.msra.mxu0 %v332_v53  ;;  %533 = vperm.xlu2 %851, %v1115_v9  }
  0xc7   : > { %v307_v56 = vpop.permute.xlu1 %306  ;;  %v339_v3 = vpop.permute.xlu0 %338  ;;  %585 = vperm.xlu0 %856, %v1109_v8   ;;  %v778_v8 = vld [vmem:[%s1217_s2 + $0x30] sm:$0xff] }
  0xc8   : > { %v320_v57 = vadd.f32 %v307_v56, %v292_v55 }
  0xca   : > { %v324_v59 = vmax.f32 %v320_v57, 0.0 }
  0xcb   : > { %v402_v29 = vpop.permute.xlu2 %401 }
  0xcc   : > { %v331_v60 = vpack.c.bf16 %v324_v59, %v323_v58  ;;  %854 = vset.pattern.permute.xlu1 %v966_v52 }
  0xcd   : > { %577 = vperm.xlu1 %854, %v1104_v7   ;;  %v575_v7 = vld [vmem:[%s1218_s3] sm:$0x1] }
  0xce   : > { %373 = vmatpush.bf16.msra.mxu0 %v331_v60  ;;  %855 = vset.pattern.permute.xlu2 %v966_v52 }
  0xcf   : > { %581 = vperm.xlu2 %855, %v1122_v10  }
  0xd0   : > { %v347_v4 = vpop.permute.xlu1 %346 }
  0xd1   : > { %725 = vmatmul.msk.bf16.vlgmr.msra.gmra.mxu0 %vm359_vm0, %v772_v61 }
  0xd5   : > { %589 = vperm.xlu1 %854, %v1115_v9   ;;  %v779_v9 = vld [vmem:[%s1217_s2 + $0x38] sm:$0xff] }
  0xd9   : > { %v406_v27 = vpop.permute.xlu1 %405 }
  0xe1   : > { %726 = vmatmul.msk.bf16.gmra.mxu0 %vm359_vm0, %v773_v62  ;;  %v398_v31 = vpop.permute.xlu1 %397 }
 0x10f   : > { %v460_v53 = vpop.permute.xlu2 %459 }
 0x118   : > { %v522_v10 = vpop.permute.xlu2 %521 }
 0x125   : > { %v472_v47 = vpop.permute.xlu1 %471  ;;  %v468_v49 = vpop.permute.xlu0 %467 }
 0x12d   : > { %v464_v50 = vpop.permute.xlu1 %463 }
 0x14e   : > { %v375_v63 = vpop.f32.mrf.mxu0 }
 0x14f   : > { %v376_v14 = vadd.f32 %v375_v63, %v335_v6  ;;  %v967_v63 = vmov 6  }
 0x150   : > { %858 = vset.pattern.permute.xlu0 %v967_v63  ;;  %857 = vset.pattern.permute.xlu2 %v967_v63 }
 0x151   : > { %v385_v19 = vmax.f32 %v376_v14, 0.0  ;;  %607 = vperm.xlu2 %857, %v575_v7  }
 0x156   : > { %v377_v0 = vpop.f32.mrf.mxu0 }
 0x157   : > { %v378_v12 = vadd.f32 %v377_v0, %v339_v3  ;;  %v530_v3 = vpop.permute.xlu1 %529 }
 0x159   : > { %v386_v17 = vmax.f32 %v378_v12, 0.0 }
 0x15b   : > { %v394_v20 = vpack.c.bf16 %v386_v17, %v385_v19 }
 0x15e   : > { %v380_v2 = vpop.f32.mrf.mxu0 }
 0x15f   : > { %v381_v5 = vadd.f32 %v380_v2, %v343_v1 }
 0x161   : > { %v387_v15 = vmax.f32 %v381_v5, 0.0  ;;  %v526_v5 = vpop.permute.xlu0 %525 }
 0x166   : > { %v382_v11 = vpop.f32.mrf.mxu0 }
 0x167   : > { %v383_v13 = vadd.f32 %v382_v11, %v347_v4  ;;  %v534_v4 = vpop.permute.xlu2 %533 }
 0x169   : > { %v388_v16 = vmax.f32 %v383_v13, 0.0  ;;  %v586_v19 = vpop.permute.xlu0 %585 }
 0x16b   : > { %v395_v18 = vpack.c.bf16 %v388_v16, %v387_v15  ;;  %v578_v15 = vpop.permute.xlu1 %577 }
 0x16d   : > { %434 = vmatpush.bf16.msra.mxu1 %v395_v18 }
 0x16f   : > { %v582_v16 = vpop.permute.xlu2 %581 }
 0x171   : > { %435 = vmatpush.bf16.msra.mxu1 %v394_v20 }
 0x174   : > { %739 = vmatmul.msk.bf16.vlgmr.msra.gmra.mxu1 %vm359_vm0, %v774_v21 }
 0x184   : > { %740 = vmatmul.msk.bf16.gmra.mxu1 %vm359_vm0, %v775_v22 }
 0x1f1   : > { %v437_v23 = vpop.f32.mrf.mxu1 }
 0x1f2   : > { %v438_v35 = vadd.f32 %v437_v23, %v398_v31 }
 0x1f4   : > { %v447_v40 = vmax.f32 %v438_v35, 0.0 }
 0x1f9   : > { %v439_v25 = vpop.f32.mrf.mxu1 }
 0x1fa   : > { %v440_v33 = vadd.f32 %v439_v25, %v402_v29 }
 0x1fc   : > { %v448_v38 = vmax.f32 %v440_v33, 0.0 }
 0x1fe   : > { %v456_v41 = vpack.c.bf16 %v448_v38, %v447_v40 }
 0x201   : > { %v442_v28 = vpop.f32.mrf.mxu1 }
 0x202   : > { %v443_v30 = vadd.f32 %v442_v28, %v406_v27  ;;  %v590_v27 = vpop.permute.xlu1 %589 }
 0x204   : > { %v449_v36 = vmax.f32 %v443_v30, 0.0 }
 0x209   : > { %v444_v32 = vpop.f32.mrf.mxu1 }
 0x20a   : > { %v445_v34 = vadd.f32 %v444_v32, %v410_v26 }
 0x20c   : > { %v450_v37 = vmax.f32 %v445_v34, 0.0 }
 0x20e   : > { %v457_v39 = vpack.c.bf16 %v450_v37, %v449_v36  ;;  %v608_v36 = vpop.permute.xlu2 %607 }
 0x210   : > { %496 = vmatpush.bf16.msra.mxu2 %v457_v39 }
 0x214   : > { %497 = vmatpush.bf16.msra.mxu2 %v456_v41 }
 0x217   : > { %753 = vmatmul.msk.bf16.vlgmr.msra.gmra.mxu2 %vm359_vm0, %v776_v42 }
 0x227   : > { %754 = vmatmul.msk.bf16.gmra.mxu2 %vm359_vm0, %v777_v43 }
 0x29a   : > { %v499_v44 = vpop.f32.mrf.mxu2 }
 0x29b   : > { %v500_v57 = vadd.f32 %v499_v44, %v460_v53 }
 0x29d   : > { %v509_v62 = vmax.f32 %v500_v57, 0.0 }
 0x2a2   : > { %v501_v46 = vpop.f32.mrf.mxu2 }
 0x2a3   : > { %v502_v55 = vadd.f32 %v501_v46, %v464_v50 }
 0x2a5   : > { %v510_v60 = vmax.f32 %v502_v55, 0.0 }
 0x2a7   : > { %v518_v0 = vpack.c.bf16 %v510_v60, %v509_v62 }
 0x2aa   : > { %v504_v48 = vpop.f32.mrf.mxu2 }
 0x2ab   : > { %v505_v51 = vadd.f32 %v504_v48, %v468_v49 }
 0x2ad   : > { %v511_v58 = vmax.f32 %v505_v51, 0.0 }
 0x2b2   : > { %v506_v54 = vpop.f32.mrf.mxu2 }
 0x2b3   : > { %v507_v56 = vadd.f32 %v506_v54, %v472_v47 }
 0x2b5   : > { %v512_v59 = vmax.f32 %v507_v56, 0.0 }
 0x2b7   : > { %v519_v61 = vpack.c.bf16 %v512_v59, %v511_v58 }
 0x2b9   : > { %558 = vmatpush.bf16.msra.mxu3 %v519_v61 }
 0x2bd   : > { %559 = vmatpush.bf16.msra.mxu3 %v518_v0 }
 0x2c0   : > { %767 = vmatmul.msk.bf16.vlgmr.msra.gmra.mxu3 %vm359_vm0, %v778_v8 }
 0x2d0   : > { %768 = vmatmul.msk.bf16.gmra.mxu3 %vm359_vm0, %v779_v9 }
 0x343   : > { %v561_v1 = vpop.f32.mrf.mxu3 }
 0x344   : > { %v562_v12 = vadd.f32 %v561_v1, %v522_v10 }
 0x346   : > { %v571_v17 = vmax.f32 %v562_v12, 0.0 }
 0x348   : > { %v592_v22 = vmul.f32 %v578_v15, %v571_v17 }
 0x34b   : > { %v563_v2 = vpop.f32.mrf.mxu3 }
 0x34c   : > { %v564_v6 = vadd.f32 %v563_v2, %v526_v5 }
 0x34e   : > { %v572_v14 = vmax.f32 %v564_v6, 0.0 }
 0x350   : > { %v593_v20 = vmul.f32 %v582_v16, %v572_v14 }
 0x352   : > { %v596_v25 = vadd.f32 %v593_v20, %v592_v22 }
 0x353   : > { %v566_v11 = vpop.f32.mrf.mxu3 }
 0x354   : > { %v567_v13 = vadd.f32 %v566_v11, %v530_v3 }
 0x356   : > { %v573_v18 = vmax.f32 %v567_v13, 0.0 }
 0x358   : > { %v594_v23 = vmul.f32 %v586_v19, %v573_v18 }
 0x35a   : > { %v597_v28 = vadd.f32 %v596_v25, %v594_v23 }
 0x35b   : > { %v568_v21 = vpop.f32.mrf.mxu3 }
 0x35c   : > { %v569_v24 = vadd.f32 %v568_v21, %v534_v4 }
 0x35e   : > { %v574_v26 = vmax.f32 %v569_v24, 0.0 }
 0x360   : > { %v595_v29 = vmul.f32 %v590_v27, %v574_v26 }
 0x362   : > { %v598_v30 = vadd.f32 %v597_v28, %v595_v29 }
 0x364   : > { %v599_v31 = vrot.slane %v598_v30, 4 }
 0x366   : > { %v600_v32 = vadd.f32 %v599_v31, %v598_v30 }
 0x368   : > { %v601_v33 = vrot.slane %v600_v32, 2 }
 0x36a   : > { %v602_v34 = vadd.f32 %v601_v33, %v600_v32 }
 0x36c   : > { %v603_v35 = vrot.slane %v602_v34, 1 }
 0x36e   : > { %v604_v37 = vadd.f32 %v603_v35, %v602_v34 }
 0x370   : > { %v610_v38 = vadd.f32 %v608_v36, %v604_v37 }
 0x372   : > { %v769_v39 = vmul.f32 -1.442695, %v610_v38 }
 0x374   : > { %859 = vpow2.f32 %v769_v39 }
 0x37a   : > { %v860_v40 = vpop.eup %859 }
 0x37b   : > { %v614_v41 = vadd.f32 1.0, %v860_v40 }
 0x37d   : > { %861 = vrcp.f32 %v614_v41  ;;  %v626_v45 = vand.u32 2147483648, %v614_v41  ;;  %v624_v47 = vand.u32 2147483647, %v614_v41  ;;  %vm620_vm2 = vweird.f32 %v614_v41 }
 0x37f   : > { %v627_v49 = vor.u32 1.1754944e-38, %v626_v45  ;;  %vm625_vm4 = vcmp.eq.f32.partialorder %v624_v47, 8.507059e+37 }
 0x383   : > { %v862_v42 = vpop.eup %861 }
 0x384   : > { %v616_v43 = vmul.f32 %v862_v42, %v614_v41  ;;  %vm621_vm1 = vweird.f32 %v862_v42 }
 0x385   : > { %vm622_vm3 = vmor %vm620_vm2, %vm621_vm1 }
 0x386   : > { %v617_v44 = vsub.f32 1.0, %v616_v43 }
 0x388   : > { %v618_v46 = vmul.f32 %v862_v42, %v617_v44 }
 0x38a   : > { %v619_v48 = vadd.f32 %v862_v42, %v618_v46 }
 0x38c   : > { %v623_v50 = vsel %vm622_vm3, %v862_v42, %v619_v48 }
 0x38d   : > { %v628_v51 = vsel %vm625_vm4, %v627_v49, %v623_v50 }
 0x38e   : > { %630 = vst [vmem:[%s213_s14] sm:$0x1] %v628_v51 }
 0x38f   : > { %920 = shalt.err (!%p917_p4)
}
 0x390   : > { %782 = dma.vmem_to_hbm [thread:$0]  (%p1043_p11), %s643_s26, 16, %s645_s20, %s632_s19  }
 0x391 PF: > { %s656_s29 = sand.u32 1, %s947_s15   ;;  %p1225_p7 = scmp.ge.s32.totalorder %s959_s18, 2 }
 0x392   : > { %s657_s9 = scalar_lea.sflag [#allocation4], %s656_s29 }
 0x393   : > { %p789_p5 = pnand %p1225_p7, %p1047_p12 }
 0x395   : > { %p790_p8 = pneg %p789_p5 }
 0x397   : > { %942 = dma.done.wait (%p790_p8), %s657_s9, 16  }
 0x398   : > { %944 = vsyncadd (%p790_p8), %s657_s9, 4294967280  ;;  %p17_p10 = scmp.ge.s32.totalorder %s1018_s21, 4   ;;  %s1226_s15 = smov %s951_s16 }
 0x399   : > { %s1227_s16 = smov %s955_s17  ;;  %s1228_s17 = smov %s1030_s24 }
 0x39a   : > { %s1229_s18 = smov %s1018_s21  ;;  %19 = sbr.rel (!%p17_p10) target bundleno = 5 (0x5), region = 84 }
 0x39f   :  { %662 = vsyncpa [#allocation3], 1 }
 0x3a0   :  { %664 = vsyncpa [#allocation3 + $0x1], 1 }
 0x3a1   :  { %665 = vsyncpa [#allocation4], 1 }
 0x3a2   :  { %667 = vsyncpa [#allocation4 + $0x1], 1 }

</bundles_post_ra>
